<compile_context>
chip_gen: v5e
topology: v5e:2x2
jax: 0.10.0
libtpu: 0.0.40
codegen_flags: <defaults>
</compile_context>

<pallas_src>
import jax
import jax.numpy as jnp
from jax.experimental import pallas as pl
from jax.experimental.pallas import tpu as pltpu


def relu_kernel(x_ref, o_ref):
    # Whole-tile element-wise max with 0 on the VPU.
    o_ref[...] = jnp.maximum(x_ref[...], jnp.zeros((), dtype=o_ref.dtype))


def _round_up(a, b):
    return ((a + b - 1) // b) * b


def _relu_2d(x2d, tm_cap):
    """Run the ReLU kernel over a 2-D (rows, cols) array.

    cols must be a multiple of 128 (or the full last dim).  The row dimension
    may be ragged w.r.t. the row tile: Pallas masks the last block (OOB reads
    are harmless for elementwise; OOB writes are dropped).
    """
    rows, cols = x2d.shape
    dtype = x2d.dtype
    itemsize = jnp.dtype(dtype).itemsize

    # Row tile: multiple of 8 (or the full row extent for tiny inputs).
    # Aim for >= 4 grid steps on mid-size inputs so ("parallel",) semantics
    # can shard across both TensorCores on v7x (neutral on v5e/v6e).
    if rows <= 8:
        tm_eff = rows
    else:
        tm_eff = min(tm_cap, max(8, _round_up(pl.cdiv(rows, 4), 8)))

    grid = (pl.cdiv(rows, tm_eff),)
    n_bytes = rows * cols * itemsize

    return pl.pallas_call(
        relu_kernel,
        out_shape=jax.ShapeDtypeStruct((rows, cols), dtype),
        grid_spec=pltpu.PrefetchScalarGridSpec(
            num_scalar_prefetch=0,
            grid=grid,
            in_specs=[pl.BlockSpec((tm_eff, cols), lambda i: (i, 0))],
            out_specs=pl.BlockSpec((tm_eff, cols), lambda i: (i, 0)),
        ),
        compiler_params=pltpu.CompilerParams(
            dimension_semantics=("parallel",),   # shards across v7x's 2 TCs
            vmem_limit_bytes=48 << 20,           # fits v7x (64 MiB physical)
        ),
        cost_estimate=pl.CostEstimate(
            flops=rows * cols,
            transcendentals=0,
            bytes_accessed=2 * n_bytes,          # bytes actually moved
        ),
    )(x2d)


def relu_forward(x, *, lane_cols=1024, tile_bytes=4 << 20):
    """Element-wise ReLU via Pallas. Works for any input shape / numeric dtype."""
    orig_shape = x.shape
    dtype = x.dtype
    n = x.size
    if n == 0:
        return x

    itemsize = jnp.dtype(dtype).itemsize
    # Row-tile cap sized so one block is ~tile_bytes regardless of dtype
    # (bf16/int8 get proportionally taller tiles -> same per-step overhead
    # amortization as f32).
    tm_cap = max(8, tile_bytes // (lane_cols * itemsize))

    # --- Zero-copy fast path: total size divisible by 128 -------------------
    # Contiguous reshape to a lane-dense 2-D slab is free; no pad, no slice.
    if n % 128 == 0:
        cols = next(c for c in (lane_cols, 1024, 512, 256, 128) if n % c == 0)
        out2d = _relu_2d(x.reshape(n // cols, cols), tm_cap)
        return out2d.reshape(orig_shape)

    # --- Ragged fallback (n % 128 != 0, rare) --------------------------------
    # Padding copies the whole array; acceptable only for this corner case.
    # Zero-padding then slicing back is exact for ReLU.
    cols = lane_cols
    while cols > 128 and n < cols:
        cols //= 2
    rows = pl.cdiv(n, cols)
    padded_n = rows * cols
    flat = jnp.pad(x.reshape(-1), (0, padded_n - n))
    out2d = _relu_2d(flat.reshape(rows, cols), tm_cap)
    return out2d.reshape(-1)[:n].reshape(orig_shape)


if __name__ == "__main__":
    # Small deterministic example consistent with a generic element-wise module.
    B, C, H, W = 2, 4, 16, 16
    key = jax.random.PRNGKey(0)
    x = jax.random.normal(key, (B, C, H, W), dtype=jnp.float32)

    out = jax.block_until_ready(relu_forward(x))
    ref = jnp.maximum(x, 0.0)
    assert out.shape == x.shape
    assert out.dtype == x.dtype
    assert jnp.allclose(out, ref, atol=0.0, rtol=0.0)

    # Zero-copy path with a ragged row grid (rows not divisible by the tile).
    x1 = jax.random.normal(jax.random.PRNGKey(2), (4, 100, 128), dtype=jnp.float32)
    out1 = jax.block_until_ready(relu_forward(x1))
    assert jnp.allclose(out1, jnp.maximum(x1, 0.0), atol=0.0, rtol=0.0)

    # Ragged fallback path (total size not divisible by 128).
    x2 = jax.random.normal(jax.random.PRNGKey(1), (3, 7, 5), dtype=jnp.float32)
    out2 = jax.block_until_ready(relu_forward(x2))
    assert jnp.allclose(out2, jnp.maximum(x2, 0.0), atol=0.0, rtol=0.0)

    print("KERNEL_OK")
</pallas_src>

<mosaic_0001>
module attributes {stable_mosaic.version = 11 : i64} {
  func.func @relu_kernel(%arg0: i32, %arg1: memref<2x1024xf32, #tpu.memory_space<vmem>>, %arg2: memref<2x1024xf32, #tpu.memory_space<vmem>>) attributes {dimension_semantics = [#tpu.dimension_semantics<parallel>], iteration_bounds = array<i64: 1>, scalar_prefetch = 0 : i64, scratch_operands = 0 : i64, tpu.core_type = #tpu.core_type<tc>, window_params = [{transform_indices = @transform_0, window_bounds = array<i64: 2, 1024>}, {transform_indices = @transform_1, window_bounds = array<i64: 2, 1024>}]} {
    %c0 = arith.constant 0 : index
    %c0_0 = arith.constant 0 : index
    %0 = vector.load %arg1[%c0, %c0_0] : memref<2x1024xf32, #tpu.memory_space<vmem>>, vector<2x1024xf32>
    %cst = arith.constant 0.000000e+00 : f32
    %1 = vector.broadcast %cst : f32 to vector<2x1024xf32>
    %2 = arith.maximumf %0, %1 : vector<2x1024xf32>
    %c0_1 = arith.constant 0 : index
    %c0_2 = arith.constant 0 : index
    %3 = vector.load %arg2[%c0_1, %c0_2] : memref<2x1024xf32, #tpu.memory_space<vmem>>, vector<2x1024xf32>
    tpu.vector_store %arg2[%c0_1, %c0_2], %2 {strides = array<i32>} : memref<2x1024xf32, #tpu.memory_space<vmem>>, vector<2x1024xf32>,
    return
  }
  func.func @transform_0(%arg0: i32) -> (i32, i32) {
    %c0_i32 = arith.constant 0 : i32
    %c0_i32_0 = arith.constant 0 : i32
    return %arg0, %c0_i32 : i32, i32
  }
  func.func @transform_1(%arg0: i32) -> (i32, i32) {
    %c0_i32 = arith.constant 0 : i32
    %c0_i32_0 = arith.constant 0 : i32
    return %arg0, %c0_i32 : i32, i32
  }
}

</mosaic_0001>

<bundles_post_ra>
// kernel: tpu_custom_call.1
= control target key start
LH: loop header
LB: loop body
LE: loop exit
PB: predicated region body
PF: predicated region fallthrough
CT: control target
= control target key end

     0   :  { %6 = vsyncpa [#allocation3], 0  ;;  %s118_s0 = inlined_call_operand.hbm [shape: f32[2,1024], index: 0, kind: input, shape index: {}]   ;;  %s119_s1 = inlined_call_operand.hbm [shape: f32[2,1024], index: 1, kind: output, shape index: {}]  }
   0x1   :  { %7 = vsyncpa [#allocation4], 0  ;;  %s13_s8 = sshll.u32 %s118_s0, 4  ;;  %s100_s9 = smov [#allocation2]   ;;  %s14_s8 = int_to_ptr.hbm [resolvable:$true] %s13_s8 }
   0x2   :  { %s15_s10 = sshll.u32 %s100_s9, 4  ;;  %s16_s10 = int_to_ptr.vmem [resolvable:$true] %s15_s10 }
   0x3   :  { %18 = dma.hbm_to_vmem [thread:$0]  %s14_s8, 256, %s16_s10, [#allocation3]  }
   0x4   :  { %96 = dma.done.wait [#allocation3], 256  }
   0x5   :  { %97 = vsyncadd [#allocation3], 4294967040  ;;  %s101_s11 = smov [#allocation5]   ;;  %s36_s15 = sshll.u32 %s119_s1, 4  ;;  %v23_v0 = vld [vmem:[#allocation2] sm:$0xff]  ;;  %v24_v1 = vld [vmem:[#allocation2 + $0x8] sm:$0xff]  ;;  %s37_s15 = int_to_ptr.hbm [resolvable:$true] %s36_s15 }
   0x6   :  { %s34_s12 = sshll.u32 %s101_s11, 4  ;;  %v25_v2 = vmax.f32 %v23_v0, 0.0  ;;  %v26_v3 = vmax.f32 %v24_v1, 0.0  ;;  %s35_s12 = int_to_ptr.vmem [resolvable:$true] %s34_s12 }
   0x8   :  { %27 = vst [vmem:[#allocation5] sm:$0xff] %v25_v2 }
   0x9   :  { %28 = vst [vmem:[#allocation5 + $0x8] sm:$0xff] %v26_v3 }
   0xa   :  { %39 = dma.vmem_to_hbm [thread:$0]  %s35_s12, 256, %s37_s15, [#allocation4]  }
   0xb   :  { %98 = dma.done.wait [#allocation4], 256  }
   0xc   :  { %99 = vsyncadd [#allocation4], 4294967040 }
   0xd   :  { %44 = vsyncpa [#allocation3], 1 }
   0xe   :  { %45 = vsyncpa [#allocation4], 1 }

</bundles_post_ra>
